<compile_context>
chip_gen: v5e
topology: v5e:2x2
jax: 0.10.0
libtpu: 0.0.40
codegen_flags: <defaults>
</compile_context>

<pallas_src>
import functools

import jax
import jax.numpy as jnp
from jax.experimental import pallas as pl
from jax.experimental.pallas import tpu as pltpu


def _pifu_kernel(calib_ref, points_ref, feat_ref, preds_ref,
                 acc_ref, wx_ref, yg_ref, *,
                 C, W, rows_per_k, x_scale, x_off, y_scale, y_off):
    """One (batch, N-tile, row-group) step.

    calib_ref : SMEM (B, 12) f32      -- row-major flattened [3,4] calib per batch
    points_ref: (1, 3, tn) f32        -- resident across the k sweep
    feat_ref  : (1, rows_per_k*C, W) bf16 -- `rows_per_k` image rows, (h, c) major
    preds_ref : (1, C, tn) f32
    acc_ref   : (C, tn) f32 scratch accumulator
    wx_ref    : (W, tn) bf16 scratch  -- separable x tent weights (per (b,n) tile)
    yg_ref    : (1, tn) f32 scratch   -- pixel y coordinates (per (b,n) tile)
    """
    b = pl.program_id(0)
    k = pl.program_id(2)
    nk = pl.num_programs(2)

    @pl.when(k == 0)
    def _():
        acc_ref[...] = jnp.zeros_like(acc_ref)

        # --- orthogonal projection, hoisted out of the k sweep ---------------
        r00 = calib_ref[b, 0]
        r01 = calib_ref[b, 1]
        r02 = calib_ref[b, 2]
        t0 = calib_ref[b, 3]
        r10 = calib_ref[b, 4]
        r11 = calib_ref[b, 5]
        r12 = calib_ref[b, 6]
        t1 = calib_ref[b, 7]
        # (row 2 / depth is only consumed by depth-aware subclasses; unused.)

        p0 = points_ref[0, 0:1, :]                 # (1, tn)
        p1 = points_ref[0, 1:2, :]
        p2 = points_ref[0, 2:3, :]

        u = r00 * p0 + r01 * p1 + r02 * p2 + t0    # (1, tn)  x -> width axis
        v = r10 * p0 + r11 * p1 + r12 * p2 + t1    # (1, tn)  y -> height axis

        xg = u * x_scale + x_off                   # pixel x coords, f32
        yg = v * y_scale + y_off                   # pixel y coords, f32
        yg_ref[...] = yg

        # --- separable x tent weights: wx[w, n] = relu(1 - |w - xg[n]|) ------
        # Built ONCE per (b, n) tile; zeros padding (OOR taps get weight 0).
        col = jax.lax.broadcasted_iota(jnp.int32, (W, 1), 0).astype(jnp.float32)
        wx = jnp.maximum(1.0 - jnp.abs(col - xg), 0.0)       # (W, tn) f32
        wx_ref[...] = wx.astype(wx_ref.dtype)                # bf16 for the MXU

    # --- MXU: (rows_per_k*C, W) @ (W, tn) -> per-row x-interpolated features --
    partial = jnp.dot(feat_ref[0], wx_ref[...],
                      preferred_element_type=jnp.float32)    # (rows_per_k*C, tn)

    # --- separable y tent weights for this row group (f32, VPU-cheap) --------
    rowi = (jax.lax.broadcasted_iota(jnp.int32, (rows_per_k, 1), 0)
            + k * rows_per_k).astype(jnp.float32)            # global row ids
    wy = jnp.maximum(1.0 - jnp.abs(rowi - yg_ref[...]), 0.0)  # (rows_per_k, tn)

    acc = acc_ref[...]
    for h in range(rows_per_k):                              # static unroll
        acc = acc + wy[h:h + 1, :] * partial[h * C:(h + 1) * C, :]
    acc_ref[...] = acc

    @pl.when(k == nk - 1)
    def _():
        preds_ref[0] = acc_ref[...].astype(preds_ref.dtype)


def pifu_forward(points, images, calibs, transforms=None, *,
                 tn=512, rows_per_k=8, align_corners=True,
                 vmem_limit_bytes=48 * 1024 * 1024):
    """points [B,3,N], images [B,C,H,W] (NCHW), calibs [B,3,4] -> preds [B,C,N]."""
    assert transforms is None  # TODO(synk): optional image-space affine not implemented
    B, C, H, W = images.shape
    Bp, three, N = points.shape
    assert Bp == B and three == 3

    tn = min(tn, N)
    rows_per_k = min(rows_per_k, H)
    assert N % tn == 0, (N, tn)
    assert (tn % 128 == 0) or (tn == N), tn
    assert H % rows_per_k == 0, (H, rows_per_k)
    rk_c = rows_per_k * C
    assert (rk_c % 8 == 0) or (rows_per_k == H), rk_c

    # Glue outside the kernel: NCHW -> (B, H*C, W) so each k block is a
    # contiguous group of image rows with row index m = h*C + c; pre-cast the
    # MXU feature operand to bf16 (halves feat HBM traffic + VMEM).
    feat = images.astype(jnp.bfloat16).transpose(0, 2, 1, 3).reshape(B, H * C, W)
    calib_flat = calibs.reshape(B, 12).astype(jnp.float32)

    if align_corners:
        x_scale, x_off = 0.5 * (W - 1), 0.5 * (W - 1)
        y_scale, y_off = 0.5 * (H - 1), 0.5 * (H - 1)
    else:  # PyTorch >= 1.3 grid_sample default
        x_scale, x_off = 0.5 * W, 0.5 * (W - 1)
        y_scale, y_off = 0.5 * H, 0.5 * (H - 1)

    grid = (B, N // tn, H // rows_per_k)
    kernel = functools.partial(_pifu_kernel, C=C, W=W, rows_per_k=rows_per_k,
                               x_scale=x_scale, x_off=x_off,
                               y_scale=y_scale, y_off=y_off)

    return pl.pallas_call(
        kernel,
        out_shape=jax.ShapeDtypeStruct((B, C, N), jnp.float32),
        grid_spec=pltpu.PrefetchScalarGridSpec(
            num_scalar_prefetch=1,                 # calibs -> SMEM
            grid=grid,
            in_specs=[
                # points: depends on (b, n); resident across the k sweep
                pl.BlockSpec((1, 3, tn), lambda b, n, k, cal: (b, 0, n)),
                # feat row-group: depends only on (b, k)
                pl.BlockSpec((1, rk_c, W), lambda b, n, k, cal: (b, k, 0)),
            ],
            # lane-dense output tile (tn multiple of 128), resident across k
            out_specs=pl.BlockSpec((1, C, tn), lambda b, n, k, cal: (b, 0, n)),
            scratch_shapes=[
                pltpu.VMEM((C, tn), jnp.float32),      # accumulator
                pltpu.VMEM((W, tn), jnp.bfloat16),     # separable x weights
                pltpu.VMEM((1, tn), jnp.float32),      # pixel y coordinates
            ],
        ),
        compiler_params=pltpu.CompilerParams(
            dimension_semantics=("parallel", "parallel", "arbitrary"),
            vmem_limit_bytes=vmem_limit_bytes,
        ),
    )(calib_flat, points, feat)


def _ref_forward(points, images, calibs, align_corners=True):
    """Pure-JAX reference: orthogonal projection + bilinear grid_sample
    (zeros padding).  Image values and the x-direction tap weights are rounded
    through bf16 to mirror the kernel's MXU operand dtypes so the comparison
    tolerance can stay tight."""
    B, C, H, W = images.shape
    rot = calibs[:, :, :3]
    trans = calibs[:, :, 3:]
    xyz = jnp.einsum("bij,bjn->bin", rot, points) + trans
    if align_corners:
        x = (xyz[:, 0] + 1.0) * 0.5 * (W - 1)      # (B, N)
        y = (xyz[:, 1] + 1.0) * 0.5 * (H - 1)
    else:
        x = ((xyz[:, 0] + 1.0) * W - 1.0) * 0.5
        y = ((xyz[:, 1] + 1.0) * H - 1.0) * 0.5
    x0 = jnp.floor(x)
    y0 = jnp.floor(y)
    fx = x - x0
    fy = y - y0
    imgs_q = images.astype(jnp.bfloat16).astype(jnp.float32)

    def bq(w):  # kernel quantizes only the x weights (wx) to bf16
        return w.astype(jnp.bfloat16).astype(jnp.float32)

    def tap(ix, iy, w):
        inb = ((ix >= 0) & (ix < W) & (iy >= 0) & (iy < H)).astype(jnp.float32)
        ixc = jnp.clip(ix, 0, W - 1).astype(jnp.int32)
        iyc = jnp.clip(iy, 0, H - 1).astype(jnp.int32)
        g = jax.vmap(lambda img, yy, xx: img[:, yy, xx])(imgs_q, iyc, ixc)  # (B,C,N)
        return g * (w * inb)[:, None, :]

    return (tap(x0, y0, bq(1 - fx) * (1 - fy))
            + tap(x0 + 1, y0, bq(fx) * (1 - fy))
            + tap(x0, y0 + 1, bq(1 - fx) * fy)
            + tap(x0 + 1, y0 + 1, bq(fx) * fy))


if __name__ == "__main__":
    B, C, H, W, N = 2, 8, 16, 16, 512

    key = jax.random.PRNGKey(0)
    k_pts, k_img, k_rot = jax.random.split(key, 3)

    # points include slightly out-of-range coords to exercise zeros padding
    points = jax.random.uniform(k_pts, (B, 3, N), jnp.float32, minval=-1.1, maxval=1.1)
    images = jax.random.normal(k_img, (B, C, H, W), jnp.float32)

    # Deterministic calibration: near-identity rotation + small translation.
    eye = jnp.tile(jnp.eye(3, dtype=jnp.float32)[None], (B, 1, 1))
    rot = eye + 0.05 * jax.random.normal(k_rot, (B, 3, 3), jnp.float32)
    trans = jnp.array([[[0.10], [-0.10], [0.0]],
                       [[-0.05], [0.05], [0.0]]], dtype=jnp.float32)
    calibs = jnp.concatenate([rot, trans], axis=-1)          # (B, 3, 4)

    # tn=256, rows_per_k=8 -> grid (2, 2, 2): exercises the N tiling, the
    # row-group accumulation (pl.when init/writeback) and the hoisted
    # per-(b,n)-tile wx / yg scratch.
    preds = pifu_forward(points, images, calibs, tn=256, rows_per_k=8)
    preds = jax.block_until_ready(preds)

    ref = _ref_forward(points, images, calibs)
    assert preds.shape == (B, C, N), preds.shape
    max_err = float(jnp.max(jnp.abs(preds - ref)))
    assert max_err < 2e-2, max_err

    print("KERNEL_OK")
</pallas_src>

<mosaic_0001>
module attributes {stable_mosaic.version = 11 : i64} {
  func.func @_pifu_kernel(%arg0: i32, %arg1: i32, %arg2: i32, %arg3: memref<2x12xf32, #tpu.memory_space<smem>>, %arg4: memref<1x3x256xf32, #tpu.memory_space<vmem>>, %arg5: memref<1x64x16xbf16, #tpu.memory_space<vmem>>, %arg6: memref<1x8x256xf32, #tpu.memory_space<vmem>>, %arg7: memref<8x256xf32, #tpu.memory_space<vmem>>, %arg8: memref<16x256xbf16, #tpu.memory_space<vmem>>, %arg9: memref<1x256xf32, #tpu.memory_space<vmem>>) attributes {dimension_semantics = [#tpu.dimension_semantics<parallel>, #tpu.dimension_semantics<parallel>, #tpu.dimension_semantics<arbitrary>], iteration_bounds = array<i64: 2, 2, 2>, scalar_prefetch = 1 : i64, scratch_operands = 3 : i64, tpu.core_type = #tpu.core_type<tc>, window_params = [{transform_indices = @transform_0, window_bounds = array<i64: 1, 3, 256>}, {transform_indices = @transform_1, window_bounds = array<i64: 1, 64, 16>}, {transform_indices = @transform_2, window_bounds = array<i64: 1, 8, 256>}]} {
    %c0_i32 = arith.constant 0 : i32
    %0 = arith.cmpi eq, %arg2, %c0_i32 : i32
    %1 = arith.extui %0 : i1 to i32
    %c0_i32_0 = arith.constant 0 : i32
    %2 = arith.cmpi ne, %1, %c0_i32_0 : i32
    scf.if %2 {
      %cst_14 = arith.constant 0.000000e+00 : f32
      %66 = vector.broadcast %cst_14 : f32 to vector<8x256xf32>
      %c0_15 = arith.constant 0 : index
      %c0_16 = arith.constant 0 : index
      %67 = vector.load %arg7[%c0_15, %c0_16] : memref<8x256xf32, #tpu.memory_space<vmem>>, vector<8x256xf32>
      tpu.vector_store %arg7[%c0_15, %c0_16], %66 {strides = array<i32>} : memref<8x256xf32, #tpu.memory_space<vmem>>, vector<8x256xf32>,
      %68 = arith.index_cast %arg0 : i32 to index
      %c0_17 = arith.constant 0 : index
      %69 = memref.load %arg3[%68, %c0_17] : memref<2x12xf32, #tpu.memory_space<smem>>
      %70 = arith.index_cast %arg0 : i32 to index
      %c1 = arith.constant 1 : index
      %71 = memref.load %arg3[%70, %c1] : memref<2x12xf32, #tpu.memory_space<smem>>
      %72 = arith.index_cast %arg0 : i32 to index
      %c2 = arith.constant 2 : index
      %73 = memref.load %arg3[%72, %c2] : memref<2x12xf32, #tpu.memory_space<smem>>
      %74 = arith.index_cast %arg0 : i32 to index
      %c3 = arith.constant 3 : index
      %75 = memref.load %arg3[%74, %c3] : memref<2x12xf32, #tpu.memory_space<smem>>
      %76 = arith.index_cast %arg0 : i32 to index
      %c4 = arith.constant 4 : index
      %77 = memref.load %arg3[%76, %c4] : memref<2x12xf32, #tpu.memory_space<smem>>
      %78 = arith.index_cast %arg0 : i32 to index
      %c5 = arith.constant 5 : index
      %79 = memref.load %arg3[%78, %c5] : memref<2x12xf32, #tpu.memory_space<smem>>
      %80 = arith.index_cast %arg0 : i32 to index
      %c6 = arith.constant 6 : index
      %81 = memref.load %arg3[%80, %c6] : memref<2x12xf32, #tpu.memory_space<smem>>
      %82 = arith.index_cast %arg0 : i32 to index
      %c7 = arith.constant 7 : index
      %83 = memref.load %arg3[%82, %c7] : memref<2x12xf32, #tpu.memory_space<smem>>
      %c0_18 = arith.constant 0 : index
      %c0_19 = arith.constant 0 : index
      %c0_20 = arith.constant 0 : index
      %84 = vector.load %arg4[%c0_18, %c0_19, %c0_20] : memref<1x3x256xf32, #tpu.memory_space<vmem>>, vector<1x1x256xf32>
      %85 = vector.shape_cast %84 : vector<1x1x256xf32> to vector<1x256xf32>
      %c0_21 = arith.constant 0 : index
      %c1_22 = arith.constant 1 : index
      %c0_23 = arith.constant 0 : index
      %86 = vector.load %arg4[%c0_21, %c1_22, %c0_23] : memref<1x3x256xf32, #tpu.memory_space<vmem>>, vector<1x1x256xf32>
      %87 = vector.shape_cast %86 : vector<1x1x256xf32> to vector<1x256xf32>
      %c0_24 = arith.constant 0 : index
      %c2_25 = arith.constant 2 : index
      %c0_26 = arith.constant 0 : index
      %88 = vector.load %arg4[%c0_24, %c2_25, %c0_26] : memref<1x3x256xf32, #tpu.memory_space<vmem>>, vector<1x1x256xf32>
      %89 = vector.shape_cast %88 : vector<1x1x256xf32> to vector<1x256xf32>
      %90 = vector.broadcast %69 : f32 to vector<1x256xf32>
      %91 = arith.mulf %90, %85 : vector<1x256xf32>
      %92 = vector.broadcast %71 : f32 to vector<1x256xf32>
      %93 = arith.mulf %92, %87 : vector<1x256xf32>
      %94 = arith.addf %91, %93 : vector<1x256xf32>
      %95 = vector.broadcast %73 : f32 to vector<1x256xf32>
      %96 = arith.mulf %95, %89 : vector<1x256xf32>
      %97 = arith.addf %94, %96 : vector<1x256xf32>
      %98 = vector.broadcast %75 : f32 to vector<1x256xf32>
      %99 = arith.addf %97, %98 : vector<1x256xf32>
      %100 = vector.broadcast %77 : f32 to vector<1x256xf32>
      %101 = arith.mulf %100, %85 : vector<1x256xf32>
      %102 = vector.broadcast %79 : f32 to vector<1x256xf32>
      %103 = arith.mulf %102, %87 : vector<1x256xf32>
      %104 = arith.addf %101, %103 : vector<1x256xf32>
      %105 = vector.broadcast %81 : f32 to vector<1x256xf32>
      %106 = arith.mulf %105, %89 : vector<1x256xf32>
      %107 = arith.addf %104, %106 : vector<1x256xf32>
      %108 = vector.broadcast %83 : f32 to vector<1x256xf32>
      %109 = arith.addf %107, %108 : vector<1x256xf32>
      %cst_27 = arith.constant 7.500000e+00 : f32
      %110 = vector.broadcast %cst_27 : f32 to vector<1x256xf32>
      %111 = arith.mulf %99, %110 : vector<1x256xf32>
      %cst_28 = arith.constant 7.500000e+00 : f32
      %112 = vector.broadcast %cst_28 : f32 to vector<1x256xf32>
      %113 = arith.addf %111, %112 : vector<1x256xf32>
      %cst_29 = arith.constant 7.500000e+00 : f32
      %114 = vector.broadcast %cst_29 : f32 to vector<1x256xf32>
      %115 = arith.mulf %109, %114 : vector<1x256xf32>
      %cst_30 = arith.constant 7.500000e+00 : f32
      %116 = vector.broadcast %cst_30 : f32 to vector<1x256xf32>
      %117 = arith.addf %115, %116 : vector<1x256xf32>
      %c0_31 = arith.constant 0 : index
      %c0_32 = arith.constant 0 : index
      %118 = vector.load %arg9[%c0_31, %c0_32] : memref<1x256xf32, #tpu.memory_space<vmem>>, vector<1x256xf32>
      tpu.vector_store %arg9[%c0_31, %c0_32], %117 {strides = array<i32>} : memref<1x256xf32, #tpu.memory_space<vmem>>, vector<1x256xf32>,
      %119 = tpu.iota {dimensions = array<i32: 0>} : vector<16x1xi32>
      %120 = arith.sitofp %119 : vector<16x1xi32> to vector<16x1xf32>
      %121 = vector.broadcast %120 : vector<16x1xf32> to vector<16x256xf32>
      %122 = vector.broadcast %113 : vector<1x256xf32> to vector<16x256xf32>
      %123 = arith.subf %121, %122 : vector<16x256xf32>
      %124 = math.absf %123 : vector<16x256xf32>
      %cst_33 = arith.constant 1.000000e+00 : f32
      %125 = vector.broadcast %cst_33 : f32 to vector<16x256xf32>
      %126 = arith.subf %125, %124 : vector<16x256xf32>
      %cst_34 = arith.constant 0.000000e+00 : f32
      %127 = vector.broadcast %cst_34 : f32 to vector<16x256xf32>
      %128 = arith.maximumf %126, %127 : vector<16x256xf32>
      %129 = arith.truncf %128 : vector<16x256xf32> to vector<16x256xbf16>
      %c0_35 = arith.constant 0 : index
      %c0_36 = arith.constant 0 : index
      %130 = vector.load %arg8[%c0_35, %c0_36] : memref<16x256xbf16, #tpu.memory_space<vmem>>, vector<16x256xbf16>
      tpu.vector_store %arg8[%c0_35, %c0_36], %129 {strides = array<i32>} : memref<16x256xbf16, #tpu.memory_space<vmem>>, vector<16x256xbf16>,
    } else {
    }
    %c0 = arith.constant 0 : index
    %c0_1 = arith.constant 0 : index
    %c0_2 = arith.constant 0 : index
    %3 = vector.load %arg5[%c0, %c0_1, %c0_2] : memref<1x64x16xbf16, #tpu.memory_space<vmem>>, vector<1x64x16xbf16>
    %4 = vector.shape_cast %3 : vector<1x64x16xbf16> to vector<64x16xbf16>
    %c0_3 = arith.constant 0 : index
    %c0_4 = arith.constant 0 : index
    %5 = vector.load %arg8[%c0_3, %c0_4] : memref<16x256xbf16, #tpu.memory_space<vmem>>, vector<16x256xbf16>
    %cst = arith.constant dense<0.000000e+00> : vector<64x256xf32>
    %6 = tpu.matmul %4, %5, %cst {dimension_numbers = #tpu.dot_dimension_numbers<[1], [0], [0], [1], [0, 0, 1, 1], [], []>} : vector<64x16xbf16>, vector<16x256xbf16>, vector<64x256xf32> -> vector<64x256xf32>
    %7 = tpu.iota {dimensions = array<i32: 0>} : vector<8x1xi32>
    %c8_i32 = arith.constant 8 : i32
    %8 = arith.muli %arg2, %c8_i32 : i32
    %9 = vector.broadcast %8 : i32 to vector<8x1xi32>
    %10 = arith.addi %7, %9 : vector<8x1xi32>
    %11 = arith.sitofp %10 : vector<8x1xi32> to vector<8x1xf32>
    %c0_5 = arith.constant 0 : index
    %c0_6 = arith.constant 0 : index
    %12 = vector.load %arg9[%c0_5, %c0_6] : memref<1x256xf32, #tpu.memory_space<vmem>>, vector<1x256xf32>
    %13 = vector.broadcast %11 : vector<8x1xf32> to vector<8x256xf32>
    %14 = vector.broadcast %12 : vector<1x256xf32> to vector<8x256xf32>
    %15 = arith.subf %13, %14 : vector<8x256xf32>
    %16 = math.absf %15 : vector<8x256xf32>
    %cst_7 = arith.constant 1.000000e+00 : f32
    %17 = vector.broadcast %cst_7 : f32 to vector<8x256xf32>
    %18 = arith.subf %17, %16 : vector<8x256xf32>
    %cst_8 = arith.constant 0.000000e+00 : f32
    %19 = vector.broadcast %cst_8 : f32 to vector<8x256xf32>
    %20 = arith.maximumf %18, %19 : vector<8x256xf32>
    %c0_9 = arith.constant 0 : index
    %c0_10 = arith.constant 0 : index
    %21 = vector.load %arg7[%c0_9, %c0_10] : memref<8x256xf32, #tpu.memory_space<vmem>>, vector<8x256xf32>
    %22 = vector.extract_strided_slice %20 {offsets = [0, 0], sizes = [1, 256], strides = [1, 1]} : vector<8x256xf32> to vector<1x256xf32>
    %23 = vector.extract_strided_slice %6 {offsets = [0, 0], sizes = [8, 256], strides = [1, 1]} : vector<64x256xf32> to vector<8x256xf32>
    %24 = vector.broadcast %22 : vector<1x256xf32> to vector<8x256xf32>
    %25 = arith.mulf %24, %23 : vector<8x256xf32>
    %26 = arith.addf %21, %25 : vector<8x256xf32>
    %27 = vector.extract_strided_slice %20 {offsets = [1, 0], sizes = [1, 256], strides = [1, 1]} : vector<8x256xf32> to vector<1x256xf32>
    %28 = vector.extract_strided_slice %6 {offsets = [8, 0], sizes = [8, 256], strides = [1, 1]} : vector<64x256xf32> to vector<8x256xf32>
    %29 = vector.broadcast %27 : vector<1x256xf32> to vector<8x256xf32>
    %30 = arith.mulf %29, %28 : vector<8x256xf32>
    %31 = arith.addf %26, %30 : vector<8x256xf32>
    %32 = vector.extract_strided_slice %20 {offsets = [2, 0], sizes = [1, 256], strides = [1, 1]} : vector<8x256xf32> to vector<1x256xf32>
    %33 = vector.extract_strided_slice %6 {offsets = [16, 0], sizes = [8, 256], strides = [1, 1]} : vector<64x256xf32> to vector<8x256xf32>
    %34 = vector.broadcast %32 : vector<1x256xf32> to vector<8x256xf32>
    %35 = arith.mulf %34, %33 : vector<8x256xf32>
    %36 = arith.addf %31, %35 : vector<8x256xf32>
    %37 = vector.extract_strided_slice %20 {offsets = [3, 0], sizes = [1, 256], strides = [1, 1]} : vector<8x256xf32> to vector<1x256xf32>
    %38 = vector.extract_strided_slice %6 {offsets = [24, 0], sizes = [8, 256], strides = [1, 1]} : vector<64x256xf32> to vector<8x256xf32>
    %39 = vector.broadcast %37 : vector<1x256xf32> to vector<8x256xf32>
    %40 = arith.mulf %39, %38 : vector<8x256xf32>
    %41 = arith.addf %36, %40 : vector<8x256xf32>
    %42 = vector.extract_strided_slice %20 {offsets = [4, 0], sizes = [1, 256], strides = [1, 1]} : vector<8x256xf32> to vector<1x256xf32>
    %43 = vector.extract_strided_slice %6 {offsets = [32, 0], sizes = [8, 256], strides = [1, 1]} : vector<64x256xf32> to vector<8x256xf32>
    %44 = vector.broadcast %42 : vector<1x256xf32> to vector<8x256xf32>
    %45 = arith.mulf %44, %43 : vector<8x256xf32>
    %46 = arith.addf %41, %45 : vector<8x256xf32>
    %47 = vector.extract_strided_slice %20 {offsets = [5, 0], sizes = [1, 256], strides = [1, 1]} : vector<8x256xf32> to vector<1x256xf32>
    %48 = vector.extract_strided_slice %6 {offsets = [40, 0], sizes = [8, 256], strides = [1, 1]} : vector<64x256xf32> to vector<8x256xf32>
    %49 = vector.broadcast %47 : vector<1x256xf32> to vector<8x256xf32>
    %50 = arith.mulf %49, %48 : vector<8x256xf32>
    %51 = arith.addf %46, %50 : vector<8x256xf32>
    %52 = vector.extract_strided_slice %20 {offsets = [6, 0], sizes = [1, 256], strides = [1, 1]} : vector<8x256xf32> to vector<1x256xf32>
    %53 = vector.extract_strided_slice %6 {offsets = [48, 0], sizes = [8, 256], strides = [1, 1]} : vector<64x256xf32> to vector<8x256xf32>
    %54 = vector.broadcast %52 : vector<1x256xf32> to vector<8x256xf32>
    %55 = arith.mulf %54, %53 : vector<8x256xf32>
    %56 = arith.addf %51, %55 : vector<8x256xf32>
    %57 = vector.extract_strided_slice %20 {offsets = [7, 0], sizes = [1, 256], strides = [1, 1]} : vector<8x256xf32> to vector<1x256xf32>
    %58 = vector.extract_strided_slice %6 {offsets = [56, 0], sizes = [8, 256], strides = [1, 1]} : vector<64x256xf32> to vector<8x256xf32>
    %59 = vector.broadcast %57 : vector<1x256xf32> to vector<8x256xf32>
    %60 = arith.mulf %59, %58 : vector<8x256xf32>
    %61 = arith.addf %56, %60 : vector<8x256xf32>
    %c0_11 = arith.constant 0 : index
    %c0_12 = arith.constant 0 : index
    %62 = vector.load %arg7[%c0_11, %c0_12] : memref<8x256xf32, #tpu.memory_space<vmem>>, vector<8x256xf32>
    tpu.vector_store %arg7[%c0_11, %c0_12], %61 {strides = array<i32>} : memref<8x256xf32, #tpu.memory_space<vmem>>, vector<8x256xf32>,
    %c1_i32 = arith.constant 1 : i32
    %63 = arith.cmpi eq, %arg2, %c1_i32 : i32
    %64 = arith.extui %63 : i1 to i32
    %c0_i32_13 = arith.constant 0 : i32
    %65 = arith.cmpi ne, %64, %c0_i32_13 : i32
    scf.if %65 {
      %c0_14 = arith.constant 0 : index
      %c0_15 = arith.constant 0 : index
      %66 = vector.load %arg7[%c0_14, %c0_15] : memref<8x256xf32, #tpu.memory_space<vmem>>, vector<8x256xf32>
      %c0_16 = arith.constant 0 : index
      %c0_17 = arith.constant 0 : index
      %c0_18 = arith.constant 0 : index
      %67 = vector.load %arg6[%c0_16, %c0_17, %c0_18] : memref<1x8x256xf32, #tpu.memory_space<vmem>>, vector<1x8x256xf32>
      %68 = vector.shape_cast %67 : vector<1x8x256xf32> to vector<8x256xf32>
      %69 = vector.shape_cast %66 : vector<8x256xf32> to vector<1x8x256xf32>
      tpu.vector_store %arg6[%c0_16, %c0_17, %c0_18], %69 {strides = array<i32>} : memref<1x8x256xf32, #tpu.memory_space<vmem>>, vector<1x8x256xf32>,
    } else {
    }
    return
  }
  func.func @transform_0(%arg0: i32, %arg1: i32, %arg2: i32, %arg3: memref<2x12xf32, #tpu.memory_space<smem>>) -> (i32, i32, i32) {
    %c0_i32 = arith.constant 0 : i32
    %c0_i32_0 = arith.constant 0 : i32
    return %arg0, %c0_i32, %arg1 : i32, i32, i32
  }
  func.func @transform_1(%arg0: i32, %arg1: i32, %arg2: i32, %arg3: memref<2x12xf32, #tpu.memory_space<smem>>) -> (i32, i32, i32) {
    %c0_i32 = arith.constant 0 : i32
    %c0_i32_0 = arith.constant 0 : i32
    return %arg0, %arg2, %c0_i32 : i32, i32, i32
  }
  func.func @transform_2(%arg0: i32, %arg1: i32, %arg2: i32, %arg3: memref<2x12xf32, #tpu.memory_space<smem>>) -> (i32, i32, i32) {
    %c0_i32 = arith.constant 0 : i32
    %c0_i32_0 = arith.constant 0 : i32
    return %arg0, %c0_i32, %arg1 : i32, i32, i32
  }
}

</mosaic_0001>

<bundles_post_ra>
// kernel: tpu_custom_call.1
= control target key start
LH: loop header
LB: loop body
LE: loop exit
PB: predicated region body
PF: predicated region fallthrough
CT: control target
= control target key end

     0   :  { %s904_s15 = smov [#allocation6]   ;;  %s1101_s0 = inlined_call_operand.vmem [shape: f32[2,12], index: 0, kind: input, shape index: {}]   ;;  %s1102_s1 = inlined_call_operand.vmem [shape: f32[2,3,512], index: 1, kind: input, shape index: {}]   ;;  %s1103_s2 = inlined_call_operand.vmem [shape: bf16[2,128,16], index: 2, kind: input, shape index: {}]   ;;  %s1104_s3 = inlined_call_operand.hbm [shape: f32[2,8,512], index: 3, kind: output, shape index: {}]  }
   0x1   :  { %1111 = sst [smem:[#allocation17_spill]] %s1102_s1  ;;  %s9_s14 = sshll.u32 %s1101_s0, 4  ;;  %s10_s14 = int_to_ptr.vmem [resolvable:$true] %s9_s14 }
   0x2   :  { %1112 = sst [smem:[#allocation18_spill]] %s1103_s2 }
   0x3   :  { %12 = dma.vmem_to_smem %s10_s14, 32, %s904_s15, [#allocation5] }
   0x4   :  { %858 = dma.done.wait [#allocation5], 32 }
   0x5   :  { %859 = vsyncadd [#allocation5], 4294967264 }
   0x6   :  { %15 = sfence }
   0x7   :  { %16 = vsyncpa [#allocation8], 0 }
   0x8   :  { %18 = vsyncpa [#allocation8 + $0x1], 0  ;;  %s929_s16 = smov 0   ;;  %s931_s17 = smov 0  }
   0x9   :  { %s933_s18 = smov 0   ;;  %s935_s19 = smov 0  }
   0xa   :  { %s937_s20 = smov 0   ;;  %s939_s21 = smov 0  }
   0xb   :  { %s941_s0 = smov 0   ;;  %s943_s22 = smov 0  }
   0xc   :  { %s945_s23 = smov 0   ;;  %s947_s24 = smov 0  }
   0xd LB: > { %1113 = sst [smem:[#allocation11_spill]] %s890_s0  ;;  %s625_s25 = sadd.s32 4294967295, %s902_s24   ;;  %s902_s24 = sphi %s947_s24, %s24_s24   ;;  %s898_s23 = sphi %s945_s23, %s1129_s23   ;;  %s894_s22 = sphi %s943_s22, %s1128_s22   ;;  %s890_s0 = sphi %s941_s0, %s1127_s0   ;;  %s886_s21 = sphi %s939_s21, %s1126_s21   ;;  %s882_s20 = sphi %s937_s20, %s1125_s20   ;;  %s878_s19 = sphi %s935_s19, %s1124_s19   ;;  %s874_s18 = sphi %s933_s18, %s1132_s18   ;;  %s870_s17 = sphi %s931_s17, %s1131_s17   ;;  %s866_s16 = sphi %s929_s16, %s1130_s16  }
   0xe   : > { %1114 = sst [smem:[#allocation12_spill]] %s894_s22  ;;  %s626_s26 = sadd.s32 4294967294, %s902_s24  }
   0xf   : > { %1115 = sst [smem:[#allocation13_spill]] %s898_s23  ;;  %s36_s27 = sadd.s32 1, %s890_s0 }
  0x10   : > { %p37_p0 = scmp.ge.s32.totalorder %s36_s27, 2  ;;  %s39_s28 = sadd.s32 1, %s894_s22 }
  0x11   : > { %s43_s29 = sadd.s32 1, %s898_s23  ;;  %p118_p1 = scmp.ne.s32.totalorder %s874_s18, %s870_s17 }
  0x12   : > { %s1134_s27 = smov (%p37_p0, %s36_s27), 0  ;;  %s1136_s28 = smov (!%p37_p0, %s39_s28), %s894_s22 }
  0x13   : > { %1116 = sst [smem:[#allocation14_spill]] %s1134_s27  ;;  %p119_p2 = scmp.eq.s32.totalorder %s625_s25, 7 }
  0x14   : > { %p124_p3 = scmp.ne.s32.totalorder %s870_s17, %s866_s16  ;;  %p41_p4 = scmp.ge.s32.totalorder %s1136_s28, 2 }
  0x15   : > { %p125_p5 = scmp.eq.s32.totalorder %s626_s26, 7  ;;  %p991_p6 = por %p119_p2, %p118_p1 }
  0x16   : > { %s1138_s28 = smov (%p41_p4, %s1136_s28), 0  ;;  %s1140_s29 = smov (!%p41_p4, %s43_s29), %s898_s23 }
  0x17   : > { %1118 = sst [smem:[#allocation15_spill]] %s1138_s28  ;;  %p998_p7 = por %p125_p5, %p124_p3 }
  0x18   : > { %p629_p8 = scmp.ge.s32.totalorder %s902_s24, 1  ;;  %p45_p9 = scmp.ge.s32.totalorder %s1140_s29, 2 }
  0x19   : > { %p169_p10 = scmp.lt.s32.totalorder %s902_s24, 9  ;;  %s104_s5 = ssub.s32 %s894_s22, %s1138_s28 }
  0x1a   : > { %s1142_s29 = smov (%p45_p9, %s1140_s29), 0  ;;  %s108_s8 = sadd.s32 1, %s874_s18 }
  0x1b   : > { %1120 = sst [smem:[#allocation16_spill]] %s1142_s29  ;;  %p170_p11 = pnand %p629_p8, %p169_p10 }
  0x1c   : > { %s103_s6 = ssub.s32 %s898_s23, %s1142_s29  ;;  %s1107_s10 = sand.u32 (!%p170_p11), 1, %s870_s17  }
  0x1d   : > { %s105_s7 = sor.u32 %s104_s5, %s103_s6  ;;  %173 = sbr.rel (%p170_p11) target bundleno = 280 (0x118), region = 28 }
  0x1e   : > { %p106_p12 = scmp.eq.s32.totalorder %s105_s7, 0  ;;  %s1016_s11 = sshll.u32 (!%p170_p11), %s882_s20, 1 }
  0x1f   : > { %s630_s12 = sshll.u32 (!%p170_p11), %s1107_s10, 4  ;;  %p205_p13 = scmp.lt.s32.totalorder (!%p170_p11), %s886_s21, 1 }
  0x20   : > { %s1012_s9 = scalar_select %p106_p12, %s874_s18, %s108_s8  }
  0x21   : > { %p207_p0 = scmp.lt.s32.totalorder (!%p170_p11), %s1016_s11, 3  ;;  %s1025_s25 = sshll.u32 (!%p170_p11), %s878_s19, 3 }
  0x22   : > { %s206_s13 = scalar_select %p205_p13, %s886_s21, 1 }
  0x23   : > { %s208_s14 = scalar_select %p207_p0, %s1016_s11, 3 }
  0x24   : > { %s632_s15 = sshll.u32 %s206_s13, 2  ;;  %p217_p1 = scmp.lt.s32.totalorder %s1025_s25, 15 }
  0x25   : > { %s210_s26 = sadd.s32 %s632_s15, %s208_s14  ;;  %s1121_s1 = sld [smem:[#allocation17_spill]] }
  0x26   : > { %s633_s5 = sshll.u32 %s210_s26, 2  ;;  %s635_s8 = sshll.u32 %s206_s13, 4 }
  0x27   : > { %s218_s29 = scalar_select %p217_p1, %s1025_s25, 15 }
  0x28   : > { %s1122_s2 = sld [smem:[#allocation18_spill]]  ;;  %s1037_s0 = scalar_lea.vmem [#allocation7], %s630_s12 }
  0x29   : > { %s220_s28 = sadd.s32 %s635_s8, %s218_s29  ;;  %p637_p2 = scmp.ne.s32.totalorder %s878_s19, 0 }
  0x2a   : > { %s636_s10 = sshll.u32 %s220_s28, 2  ;;  %s638_s14 = sshll.u32 (!%p637_p2), %s886_s21, 7 }
  0x2b   : > { %s212_s20 = scalar_lea.vmem %s1121_s1, %s633_s5  ;;  %229 = sbr.rel (%p637_p2) target bundleno = 79 (0x4f), region = 32 }
  0x2c   : > { %s233_s15 = sld [smem:[#allocation6 + %s638_s14]] (!%p637_p2)  ;;  %s234_s26 = sadd.s32 (!%p637_p2), 1, %s638_s14 }
  0x2d   : > { %s235_s13 = sld [smem:[#allocation6 + %s234_s26]] (!%p637_p2)  ;;  %s236_s29 = sadd.s32 (!%p637_p2), 2, %s638_s14 }
  0x2e   : > { %s1035_s22 = scalar_lea.vmem %s1122_s2, %s636_s10  ;;  %s237_s28 = sld [smem:[#allocation6 + %s236_s29]] (!%p637_p2) }
  0x2f   : > { %s240_s5 = sadd.s32 (!%p637_p2), 4, %s638_s14  ;;  %s242_s23 = sadd.s32 (!%p637_p2), 5, %s638_s14 }
  0x30   : > { %v905_v0 = vmov 0.0   ;;  %s241_s6 = sld [smem:[#allocation6 + %s240_s5]]  ;;  %s244_s10 = sadd.s32 6, %s638_s14  ;;  %v248_v1 = vld [vmem:[%s212_s20] ss:$4 sm:$0x3]  ;;  %v277_v5 = vlaneseq }
  0x31   : > { %230 = vst [vmem:[#allocation2] sm:$0xff] %v905_v0  ;;  %s243_s27 = sld [smem:[#allocation6 + %s242_s23]]  ;;  %s246_s7 = sadd.s32 7, %s638_s14  ;;  %v639_v2 = vld [vmem:[%s212_s20 + $0x1] ss:$4 sm:$0x3] }
  0x32   : > { %231 = vst [vmem:[#allocation2 + $0x8] sm:$0xff] %v905_v0  ;;  %s245_s12 = sld [smem:[#allocation6 + %s244_s10]]  ;;  %v640_v3 = vld [vmem:[%s212_s20 + $0x2] ss:$4 sm:$0x3]  ;;  %v253_v4 = vstv %s233_s15  ;;  %s238_s1 = sadd.s32 3, %s638_s14 }
  0x33   : > { %s247_s8 = sld [smem:[#allocation6 + %s246_s7]]  ;;  %v254_v6 = vmul.f32 %v253_v4, %v248_v1  ;;  %v255_v7 = vstv %s235_s13  ;;  %v283_v14 = vshrl.u32 %v277_v5, 7  ;;  %vm279_vm0 = vcmp.lt.s32.totalorder %v277_v5, 256 }
  0x34   : > { %s239_s2 = sld [smem:[#allocation6 + %s238_s1]]  ;;  %v256_v8 = vmul.f32 %v639_v2, %v255_v7  ;;  %v258_v9 = vstv %s237_s28 }
  0x35   : > { %v259_v10 = vmul.f32 %v640_v3, %v258_v9  ;;  %v284_v24 = vadd.s32 8, %v283_v14  ;;  %v285_v29 = vcvt.s32.f32 %v283_v14 }
  0x36   : > { %v263_v11 = vstv %s241_s6  ;;  %v257_v15 = vadd.f32 %v256_v8, %v254_v6 }
  0x37   : > { %v264_v12 = vmul.f32 %v263_v11, %v248_v1  ;;  %v265_v13 = vstv %s243_s27  ;;  %v286_v30 = vcvt.s32.f32 %v284_v24 }
  0x38   : > { %v266_v16 = vmul.f32 %v639_v2, %v265_v13  ;;  %v268_v17 = vstv %s245_s12  ;;  %v260_v19 = vadd.f32 %v259_v10, %v257_v15 }
  0x39   : > { %v269_v18 = vmul.f32 %v640_v3, %v268_v17  ;;  %v271_v22 = vstv %s247_s8 }
  0x3a   : > { %v267_v20 = vadd.f32 %v266_v16, %v264_v12  ;;  %v261_v21 = vstv %s239_s2 }
  0x3b   : > { %v262_v23 = vadd.f32 %v261_v21, %v260_v19 }
  0x3c   : > { %v270_v25 = vadd.f32 %v269_v18, %v267_v20 }
  0x3d   : > { %v273_v26 = vmul.f32 7.5, %v262_v23 }
  0x3e   : > { %v272_v27 = vadd.f32 %v271_v22, %v270_v25 }
  0x3f   : > { %v274_v28 = vadd.f32 7.5, %v273_v26 }
  0x40   : > { %v275_v31 = vmul.f32 7.5, %v272_v27 }
  0x41   : > { %v288_v32 = vperm.slane %v274_v28, 0  ;;  %v289_v33 = vperm.slane %v274_v28, 1 }
  0x42   : > { %v276_v34 = vadd.f32 7.5, %v275_v31 }
  0x43   : > { %v292_v35 = vsub.f32 %v285_v29, %v288_v32  ;;  %v293_v36 = vsub.f32 %v285_v29, %v289_v33  ;;  %v294_v37 = vsub.f32 %v286_v30, %v288_v32  ;;  %v295_v38 = vsub.f32 %v286_v30, %v289_v33 }
  0x44   : > { %281 = vst.msk [vmem:[#allocation4] sm:$0x3] %vm279_vm0, %v276_v34 }
  0x45   : > { %v296_v39 = vand.u32 2147483647, %v292_v35  ;;  %v297_v40 = vand.u32 2147483647, %v293_v36  ;;  %v298_v41 = vand.u32 2147483647, %v294_v37 }
  0x46   : > { %v299_v42 = vand.u32 2147483647, %v295_v38 }
  0x47   : > { %v300_v43 = vsub.f32 1.0, %v296_v39  ;;  %v301_v44 = vsub.f32 1.0, %v297_v40  ;;  %v302_v45 = vsub.f32 1.0, %v298_v41 }
  0x48   : > { %v303_v46 = vsub.f32 1.0, %v299_v42 }
  0x49   : > { %v304_v47 = vmax.f32 %v300_v43, 0.0  ;;  %v305_v48 = vmax.f32 %v301_v44, 0.0  ;;  %v306_v49 = vmax.f32 %v302_v45, 0.0 }
  0x4a   : > { %v307_v50 = vmax.f32 %v303_v46, 0.0 }
  0x4b   : > { %v308_v51 = vpack.c.bf16 %v305_v48, %v304_v47 }
  0x4c   : > { %v309_v52 = vpack.c.bf16 %v307_v50, %v306_v49 }
  0x4d   : > { %310 = vst [vmem:[#allocation3] sm:$0xff] %v308_v51 }
  0x4e   : > { %311 = vst [vmem:[#allocation3 + $0x8] sm:$0xff] %v309_v52 }
  0x4f PF: > { %v681_v59 = vld [vmem:[%s1035_s22] sm:$0xff]  ;;  %v683_v60 = vld [vmem:[%s1035_s22 + $0x10] sm:$0xff]  ;;  %vm352_vm1 = vcmask 130048   ;;  %v682_v61 = vld [vmem:[%s1035_s22 + $0x8] sm:$0xff]  ;;  %v423_v63 = vlaneseq  ;;  %v426_v1 = vstv %s1025_s25  ;;  %p674_p3 = scmp.ne.s32.totalorder %s878_s19, 1 }
  0x50   : > { %v684_v62 = vld [vmem:[%s1035_s22 + $0x18] sm:$0xff]  ;;  %v429_v3 = vld [vmem:[#allocation4] sm:$0x3]  ;;  %v444_v34 = vld [vmem:[#allocation2 + $0x8] sm:$0xff] }
  0x51   : > { %v424_v0 = vshrl.u32 %v423_v63, 7  ;;  %v431_v5 = vperm.slane %v429_v3, 0  ;;  %v432_v6 = vperm.slane %v429_v3, 1  ;;  %v443_v31 = vld [vmem:[#allocation2] sm:$0xff] }
  0x53   : > { %v427_v2 = vadd.s32 %v426_v1, %v424_v0 }
  0x54   : > { %v659_v53 = vld [vmem:[#allocation3] sm:$0xf]  ;;  %v685_v55 = vld [vmem:[#allocation3 + $0x4] sm:$0xf] }
  0x55   : > { %v686_v54 = vld [vmem:[#allocation3 + $0x4] sm:$0xf0]  ;;  %v661_v57 = vld [vmem:[#allocation3 + $0x8] sm:$0xf0]  ;;  %v428_v4 = vcvt.s32.f32 %v427_v2 }
  0x56   : > { %v660_v56 = vor.u32 %v686_v54, %v659_v53  ;;  %v664_v58 = vor.u32 %v685_v55, %v661_v57 }
  0x57   : > { %v435_v7 = vsub.f32 %v428_v4, %v431_v5  ;;  %v436_v8 = vsub.f32 %v428_v4, %v432_v6 }
  0x58   : > { %372 = vmatpush.bf16.msra.mxu0 %v660_v56  ;;  %687 = vmatpush.bf16.msra.mxu2 %v660_v56 }
  0x59   : > { %401 = vmatpush.bf16.msra.mxu1 %v664_v58  ;;  %688 = vmatpush.bf16.msra.mxu3 %v664_v58  ;;  %v437_v10 = vand.u32 2147483647, %v435_v7  ;;  %v438_v12 = vand.u32 2147483647, %v436_v8 }
  0x5b   : > { %665 = vmatmul.msk.bf16.vlgmr.msra.gmra.mxu0 %vm352_vm1, %v681_v59  ;;  %667 = vmatmul.msk.bf16.vlgmr.msra.gmra.mxu2 %vm352_vm1, %v683_v60  ;;  %v439_v13 = vsub.f32 1.0, %v437_v10  ;;  %v440_v14 = vsub.f32 1.0, %v438_v12 }
  0x5c   : > { %669 = vmatmul.msk.bf16.vlgmr.msra.gmra.mxu1 %vm352_vm1, %v681_v59  ;;  %671 = vmatmul.msk.bf16.vlgmr.msra.gmra.mxu3 %vm352_vm1, %v683_v60 }
  0x5d   : > { %v441_v18 = vmax.f32 %v439_v13, 0.0  ;;  %v442_v20 = vmax.f32 %v440_v14, 0.0 }
  0x5f   : > { %v445_v21 = vperm.slane %v441_v18, 0  ;;  %v446_v22 = vperm.slane %v442_v20, 0  ;;  %v451_v24 = vperm.slane %v441_v18, 1  ;;  %v452_v26 = vperm.slane %v442_v20, 1 }
  0x60   : > { %v457_v29 = vperm.slane %v441_v18, 2  ;;  %v458_v33 = vperm.slane %v442_v20, 2  ;;  %v463_v39 = vperm.slane %v441_v18, 3  ;;  %v464_v43 = vperm.slane %v442_v20, 3 }
  0x61   : > { %v469_v44 = vperm.slane %v441_v18, 4  ;;  %v470_v47 = vperm.slane %v442_v20, 4  ;;  %v475_v50 = vperm.slane %v441_v18, 5  ;;  %v476_v54 = vperm.slane %v442_v20, 5 }
  0x62   : > { %v481_v58 = vperm.slane %v441_v18, 6  ;;  %v487_v1 = vperm.slane %v441_v18, 7  ;;  %v488_v5 = vperm.slane %v442_v20, 7 }
  0x6b   : > { %666 = vmatmul.msk.bf16.gmra.mxu0 %vm352_vm1, %v682_v61  ;;  %668 = vmatmul.msk.bf16.gmra.mxu2 %vm352_vm1, %v684_v62 }
  0x6c   : > { %670 = vmatmul.msk.bf16.gmra.mxu1 %vm352_vm1, %v682_v61  ;;  %672 = vmatmul.msk.bf16.gmra.mxu3 %vm352_vm1, %v684_v62  ;;  %v482_v61 = vperm.slane %v442_v20, 6 }
  0xd8   : > { %v374_v9 = vpop.f32.mrf.mxu0 }
  0xd9   : > { %v403_v11 = vpop.f32.mrf.mxu1  ;;  %v447_v28 = vmul.f32 %v445_v21, %v374_v9 }
  0xda   : > { %v448_v32 = vmul.f32 %v446_v22, %v403_v11 }
  0xdb   : > { %v449_v37 = vadd.f32 %v447_v28, %v443_v31 }
  0xdc   : > { %v450_v40 = vadd.f32 %v448_v32, %v444_v34 }
  0xde   : > { %v384_v15 = vpop.f32.mrf.mxu2 }
  0xdf   : > { %v413_v16 = vpop.f32.mrf.mxu3  ;;  %v471_v57 = vmul.f32 %v469_v44, %v384_v15 }
  0xe0   : > { %v376_v17 = vpop.f32.mrf.mxu0  ;;  %v472_v60 = vmul.f32 %v470_v47, %v413_v16 }
  0xe1   : > { %v405_v19 = vpop.f32.mrf.mxu1  ;;  %v453_v35 = vmul.f32 %v451_v24, %v376_v17 }
  0xe2   : > { %v454_v36 = vmul.f32 %v452_v26, %v405_v19 }
  0xe3   : > { %v455_v45 = vadd.f32 %v453_v35, %v449_v37 }
  0xe4   : > { %v456_v48 = vadd.f32 %v454_v36, %v450_v40 }
  0xe6   : > { %v386_v23 = vpop.f32.mrf.mxu2 }
  0xe7   : > { %v415_v25 = vpop.f32.mrf.mxu3  ;;  %v477_v63 = vmul.f32 %v475_v50, %v386_v23 }
  0xe8   : > { %v379_v27 = vpop.f32.mrf.mxu0  ;;  %v478_v2 = vmul.f32 %v476_v54, %v415_v25 }
  0xe9   : > { %v408_v30 = vpop.f32.mrf.mxu1  ;;  %v459_v38 = vmul.f32 %v457_v29, %v379_v27 }
  0xea   : > { %v460_v41 = vmul.f32 %v458_v33, %v408_v30 }
  0xeb   : > { %v461_v51 = vadd.f32 %v459_v38, %v455_v45 }
  0xec   : > { %v462_v55 = vadd.f32 %v460_v41, %v456_v48 }
  0xee   : > { %v389_v42 = vpop.f32.mrf.mxu2 }
  0xef   : > { %v418_v46 = vpop.f32.mrf.mxu3  ;;  %v483_v6 = vmul.f32 %v481_v58, %v389_v42 }
  0xf0   : > { %v381_v49 = vpop.f32.mrf.mxu0  ;;  %v484_v9 = vmul.f32 %v482_v61, %v418_v46 }
  0xf1   : > { %v465_v52 = vmul.f32 %v463_v39, %v381_v49  ;;  %v410_v53 = vpop.f32.mrf.mxu1 }
  0xf2   : > { %v466_v56 = vmul.f32 %v464_v43, %v410_v53 }
  0xf3   : > { %v467_v59 = vadd.f32 %v465_v52, %v461_v51 }
  0xf4   : > { %v468_v62 = vadd.f32 %v466_v56, %v462_v55 }
  0xf5   : > { %v473_v0 = vadd.f32 %v471_v57, %v467_v59 }
  0xf6   : > { %v474_v3 = vadd.f32 %v472_v60, %v468_v62  ;;  %v391_v4 = vpop.f32.mrf.mxu2 }
  0xf7   : > { %v479_v7 = vadd.f32 %v477_v63, %v473_v0  ;;  %v420_v8 = vpop.f32.mrf.mxu3  ;;  %v489_v12 = vmul.f32 %v487_v1, %v391_v4 }
  0xf8   : > { %v480_v10 = vadd.f32 %v478_v2, %v474_v3  ;;  %v490_v14 = vmul.f32 %v488_v5, %v420_v8 }
  0xf9   : > { %v485_v11 = vadd.f32 %v483_v6, %v479_v7 }
  0xfa   : > { %v486_v13 = vadd.f32 %v484_v9, %v480_v10  ;;  %498 = sbr.rel (%p674_p3) target bundleno = 263 (0x107), region = 36 }
  0xfb   : > { %v491_v15 = vadd.f32 %v489_v12, %v485_v11 }
  0xfc   : > { %v492_v16 = vadd.f32 %v490_v14, %v486_v13 }
  0xfd   : > { %493 = vst [vmem:[#allocation2] sm:$0xff] %v491_v15 }
  0xfe   : > { %494 = vst [vmem:[#allocation2 + $0x8] sm:$0xff] %v492_v16 }
 0x104   : > { %v499_v17 = vld [vmem:[#allocation2] sm:$0xff] }
 0x105   : > { %v500_v18 = vld [vmem:[#allocation2 + $0x8] sm:$0xff]  ;;  %501 = vst [vmem:[%s1037_s0] sm:$0xff] %v499_v17 }
 0x106   : > { %502 = vst [vmem:[%s1037_s0 + $0x8] sm:$0xff] %v500_v18 }
 0x107 PF: > { %s677_s1 = sshll.u32 %s886_s21, 2  ;;  %s519_s22 = sshll.u32 %s1037_s0, 4  ;;  %s520_s22 = int_to_ptr.vmem [resolvable:$true] %s519_s22 }
 0x108   : > { %s515_s2 = sadd.s32 %s677_s1, %s1016_s11  ;;  %s1123_s26 = sand.u32 1, %s870_s17  }
 0x109   : > { %s678_s25 = sshll.u32 %s515_s2, 3  ;;  %s504_s13 = scalar_lea.sflag [#allocation8], %s1123_s26 }
 0x10a   : > { %s517_s19 = scalar_lea.hbm %s1104_s3, %s678_s25  ;;  %s810_s0 = scalar_lea.hbm %s1104_s3, 64 }
 0x10b   : > { %s521_s15 = sshll.u32 %s517_s19, 4  ;;  %s522_s15 = int_to_ptr.hbm [resolvable:$true] %s521_s15 }
 0x10c   : > { %s804_s29 = sshra.s32 %s522_s15, 4  ;;  %s805_s29 = int_to_ptr.hbm [resolvable:$true] %s804_s29 }
 0x10d   : > { %s806_s28 = scalar_lea.hbm %s805_s29, 16  ;;  %p811_p9 = scmp.lt.s32.totalorder %s805_s29, %s1104_s3 }
 0x10e   : > { %p807_p4 = scmp.ne.s32.totalorder %s805_s29, %s806_s28  ;;  %p812_p10 = scmp.lt.s32.totalorder %s810_s0, %s806_s28 }
 0x110   : > { %p808_p5 = pnand %p807_p4, %p991_p6  ;;  %p813_p11 = por %p812_p10, %p811_p9 }
 0x112   : > { %p809_p8 = pneg %p808_p5 }
 0x114   : > { %p814_p12 = pnand %p813_p11, %p809_p8 }
 0x116   : > { %817 = shalt.err (!%p814_p12)
}
 0x117   : > { %689 = dma.vmem_to_hbm [thread:$0]  (%p991_p6), %s520_s22, 256, %s522_s15, %s504_s13  }
 0x118 PF: > { %p695_p13 = scmp.ge.s32.totalorder %s902_s24, 2  ;;  %s533_s23 = sand.u32 1, %s866_s16  }
 0x119   : > { %s534_s27 = scalar_lea.sflag [#allocation8], %s533_s23 }
 0x11a   : > { %p692_p0 = pnand %p695_p13, %p998_p7 }
 0x11c   : > { %p693_p1 = pneg %p692_p0 }
 0x11e   : > { %861 = dma.done.wait (%p693_p1), %s534_s27, 256  }
 0x11f   : > { %863 = vsyncadd (%p693_p1), %s534_s27, 4294967040  ;;  %s24_s24 = sadd.s32 1, %s902_s24   ;;  %s1124_s19 = sld [smem:[#allocation11_spill]] }
 0x120   : > { %p21_p2 = scmp.ge.s32.totalorder %s24_s24, 10   ;;  %s1125_s20 = sld [smem:[#allocation12_spill]] }
 0x121   : > { %s1126_s21 = sld [smem:[#allocation13_spill]]  ;;  %s1130_s16 = smov %s870_s17 }
 0x122   : > { %s1127_s0 = sld [smem:[#allocation14_spill]]  ;;  %s1131_s17 = smov %s874_s18 }
 0x123   : > { %s1128_s22 = sld [smem:[#allocation15_spill]]  ;;  %s1132_s18 = smov %s1012_s9 }
 0x124   : > { %s1129_s23 = sld [smem:[#allocation16_spill]]  ;;  %23 = sbr.rel (!%p21_p2) target bundleno = 13 (0xd), region = 76 }
 0x129   :  { %540 = vsyncpa [#allocation8], 1 }
 0x12a   :  { %542 = vsyncpa [#allocation8 + $0x1], 1 }

</bundles_post_ra>
